<compile_context>
chip_gen: v5e
topology: v5e:2x2
jax: 0.10.0
libtpu: 0.0.40
codegen_flags: <defaults>
</compile_context>

<pallas_src>
import functools

import jax
import jax.numpy as jnp
from jax.experimental import pallas as pl
from jax.experimental.pallas import tpu as pltpu


# ----------------------------------------------------------------------------
# Small helpers
# ----------------------------------------------------------------------------
def _is_pow2(v):
    return v > 0 and (v & (v - 1)) == 0


def _vmem_capacity_bytes():
    """Generation-aware VMEM capacity; conservative v7x-sized fallback."""
    try:
        return int(pltpu.get_tpu_info().vmem_capacity_bytes)
    except Exception:                      # query unavailable -> assume 64 MiB (v7x/TC)
        return 64 * 1024 * 1024


@functools.lru_cache(maxsize=None)
def _roll_shift_sign():
    """Empirically pin down pltpu.roll's direction (one tiny kernel, cached).

    Returns `sign` such that pltpu.roll(x, shift=(sign*d) % n, axis=1)[:, j] == x[:, (j+d) % n].
    """
    def probe(x_ref, o_ref):
        o_ref[...] = pltpu.roll(x_ref[...], shift=1, axis=1)

    x = jax.lax.broadcasted_iota(jnp.float32, (8, 128), 1)
    y = pl.pallas_call(probe, out_shape=jax.ShapeDtypeStruct((8, 128), jnp.float32))(x)
    # numpy convention (y[j] == x[j-1]) -> y[0, 1] == x[0, 0] == 0 -> use negative shifts.
    return -1 if float(y[0, 1]) == 0.0 else 1


def _choose_lane_tile(n_pad, cp, c, itemsize, budget_bytes):
    """Largest lane tile (multiple of 128 dividing n_pad, or n_pad) fitting the budget."""
    cands = sorted({n_pad} | {t for t in range(128, n_pad, 128) if n_pad % t == 0},
                   reverse=True)
    for tn in cands:
        est = (2 * cp * n_pad            # resident input slab (double-buffered)
               + 20 * cp * tn            # rolled / masked / stacked tap temporaries
               + 4 * c * tn              # matmul result + output tile (double-buffered)
               + 6 * tn                  # iota / mask / position temporaries
               + 2 * (9 * c * cp + c)) * itemsize
        if est <= budget_bytes:
            return tn
    # TODO(synk): stream halo'd lane tiles of x via pltpu.make_async_copy instead of
    # keeping the whole slab resident when even the smallest tile overflows the budget.
    return cands[-1]


# ----------------------------------------------------------------------------
# Fused kernel: 3x3 SAME conv (both branches pre-folded) + bias + ReLU.
# One grid step = one lane tile of the (Cp, B*H*W) slab.
# ----------------------------------------------------------------------------
def _make_kernel(H, W, n_pad, tn, n_tiles, use_iota, shift_sign):
    hw = H * W

    def compute(x_ref, pos, w_ref, b_ref, o_ref):
        x = x_ref[...]                                      # (Cp, N_pad), resident slab
        start = pl.multiple_of(pl.program_id(0) * tn, tn)   # lane offset of this tile

        if use_iota:
            # In-kernel boundary-mask indices (power-of-two H, W): no mask input at all.
            j = jax.lax.broadcasted_iota(jnp.int32, (1, tn), 1) + start
            p = j & (hw - 1)                                # flat position inside image
            ww = p & (W - 1)                                # column inside its row
        else:
            p, ww = pos[0:1, :], pos[1:2, :]                # precomputed (2, tn) map

        taps = []
        for k in range(9):                                  # static unroll over 3x3 taps
            oy, ox = k // 3 - 1, k % 3 - 1
            s = oy * W + ox                                 # flat lane shift of this tap
            if s == 0:
                xs = x
            else:
                # XLU lane rotation instead of concat + unaligned slice (no VMEM copies).
                xs = pltpu.roll(x, shift=(shift_sign * s) % n_pad, axis=1)
            if n_tiles > 1:
                xs = jax.lax.dynamic_slice_in_dim(xs, start, tn, axis=1)
            # Mask on the tile (after the slice): zero every tap falling outside its own
            # image; this also kills the roll's wrap-around / cross-image / pad reads.
            valid = None
            if oy == -1:
                valid = p >= W
            elif oy == 1:
                valid = p < (H - 1) * W
            if ox == -1:
                cnd = ww >= 1
                valid = cnd if valid is None else valid & cnd
            elif ox == 1:
                cnd = ww <= W - 2
                valid = cnd if valid is None else valid & cnd
            if valid is not None:
                xs = jnp.where(valid, xs, 0.0)
            taps.append(xs)

        # 8-aligned sublane stack (channels padded to Cp) -> one K = 9*Cp MXU matmul.
        xk = jnp.concatenate(taps, axis=0)                  # (9*Cp, tn)
        y = jnp.dot(w_ref[...], xk, preferred_element_type=jnp.float32)
        o_ref[...] = jnp.maximum(y + b_ref[...], 0.0).astype(o_ref.dtype)

    if use_iota:
        def kernel(x_ref, w_ref, b_ref, o_ref):
            compute(x_ref, None, w_ref, b_ref, o_ref)
    else:
        def kernel(x_ref, pos_ref, w_ref, b_ref, o_ref):
            compute(x_ref, pos_ref[...], w_ref, b_ref, o_ref)
    return kernel


# ----------------------------------------------------------------------------
# Full SimpleMARM forward (NCHW in / NCHW out, OIHW weights, like the torch module)
# ----------------------------------------------------------------------------
def simple_marm_forward(x, params):
    """relu(0.5 * (conv1(x) + rot90^-1(conv2(rot90(x))))) as one fused Pallas kernel."""
    w1, b1, w2, b2 = params                                 # OIHW weights, (C,) biases
    B, C, H, W = x.shape
    hw = H * W
    n = B * hw
    itemsize = 4

    # (1) Fold the rotated branch into a spatial weight rotation (exact for 3x3/stride-1/
    #     SAME cross-correlation) and fold the 0.5 average + both biases.
    w_eff = 0.5 * (w1 + jnp.rot90(w2, k=-1, axes=(2, 3)))              # (Cout, Cin, 3, 3)
    cp = ((C + 7) // 8) * 8                                            # Cin -> sublane tile
    w_taps = jnp.transpose(w_eff, (2, 3, 0, 1)).reshape(9, C, C)       # [tap, out, in]
    w_taps = jnp.pad(w_taps, ((0, 0), (0, 0), (0, cp - C)))            # zero pad channels
    w_fused = jnp.transpose(w_taps, (1, 0, 2)).reshape(C, 9 * cp).astype(jnp.float32)
    b_eff = (0.5 * (b1 + b2)).astype(jnp.float32).reshape(C, 1)

    # (2) Channel-major, batch-in-lanes layout (Cp, B*H*W), zero padded so the sublane
    #     stack and the lane tiles are aligned.  Padding never leaks into real outputs:
    #     every cross-image / out-of-image tap is masked inside the kernel.
    n_pad = ((n + 127) // 128) * 128
    xf = jnp.transpose(x, (1, 0, 2, 3)).reshape(C, n).astype(jnp.float32)
    if cp != C or n_pad != n:
        xf = jnp.pad(xf, ((0, cp - C), (0, n_pad - n)))

    # (3) Masks fully in-kernel (iota + bit ops) when H, W are powers of two; otherwise
    #     ship a tiny (2, N_pad) int32 position map (4.5x smaller than per-tap masks).
    use_iota = _is_pow2(W) and _is_pow2(hw)
    extra_inputs = ()
    if not use_iota:
        jj = jnp.arange(n_pad, dtype=jnp.int32)
        p_img = jj % hw
        extra_inputs = (jnp.stack([p_img, p_img % W]).astype(jnp.int32),)

    # (4) Lane tiling + generation-aware VMEM budget (whole slab stays resident as long
    #     as it fits ~1/4 of this chip's VMEM).
    vmem_cap = _vmem_capacity_bytes()
    tn = _choose_lane_tile(n_pad, cp, C, itemsize, budget_bytes=vmem_cap // 4)
    n_tiles = n_pad // tn
    working = (2 * cp * n_pad + 24 * cp * tn + 9 * C * cp + C) * itemsize
    vmem_limit = int(min(max(4 * working, 16 * 1024 * 1024), (vmem_cap * 45) // 100))

    in_specs = [pl.BlockSpec((cp, n_pad), lambda t: (0, 0))]           # resident image slab
    if not use_iota:
        in_specs.append(pl.BlockSpec((2, tn), lambda t: (0, t)))       # position map tile
    in_specs += [
        pl.BlockSpec((C, 9 * cp), lambda t: (0, 0)),                   # fused tap weights
        pl.BlockSpec((C, 1), lambda t: (0, 0)),                        # fused bias
    ]

    out_flat = pl.pallas_call(
        _make_kernel(H, W, n_pad, tn, n_tiles, use_iota, _roll_shift_sign()),
        out_shape=jax.ShapeDtypeStruct((C, n_pad), x.dtype),
        grid_spec=pltpu.PrefetchScalarGridSpec(
            num_scalar_prefetch=0,
            grid=(n_tiles,),
            in_specs=in_specs,
            out_specs=pl.BlockSpec((C, tn), lambda t: (0, t)),
        ),
        compiler_params=pltpu.CompilerParams(
            dimension_semantics=("parallel",),                         # dual-TC on v7x
            vmem_limit_bytes=vmem_limit),
    )(xf, *extra_inputs, w_fused, b_eff)

    return jnp.transpose(out_flat[:, :n].reshape(C, B, H, W), (1, 0, 2, 3))


# ----------------------------------------------------------------------------
# Pure-JAX reference: literal translation of the torch forward (for validation).
# ----------------------------------------------------------------------------
def reference_forward(x, params):
    w1, b1, w2, b2 = params

    def conv(v, w, b):
        y = jax.lax.conv_general_dilated(
            v, w, window_strides=(1, 1), padding=((1, 1), (1, 1)),
            dimension_numbers=("NCHW", "OIHW", "NCHW"),
            precision=jax.lax.Precision.HIGHEST)
        return y + b[None, :, None, None]

    y1 = conv(x, w1, b1)
    x2 = jnp.rot90(x, k=1, axes=(2, 3))
    y2 = conv(x2, w2, b2)
    y2 = jnp.rot90(y2, k=-1, axes=(2, 3))
    return jnp.maximum((y1 + y2) * 0.5, 0.0)


if __name__ == "__main__":
    B, C, H, W = 2, 4, 16, 16

    key = jax.random.PRNGKey(0)
    kx, kw1, kb1, kw2, kb2 = jax.random.split(key, 5)

    # torch.nn.Conv2d-style deterministic init, OIHW layout (like the PyTorch module).
    fan_in = C * 3 * 3
    bound = 1.0 / (fan_in ** 0.5)
    w1 = jax.random.uniform(kw1, (C, C, 3, 3), jnp.float32, -bound, bound)
    b1 = jax.random.uniform(kb1, (C,), jnp.float32, -bound, bound)
    w2 = jax.random.uniform(kw2, (C, C, 3, 3), jnp.float32, -bound, bound)
    b2 = jax.random.uniform(kb2, (C,), jnp.float32, -bound, bound)
    params = (w1, b1, w2, b2)

    x = jax.random.normal(kx, (B, C, H, W), jnp.float32)

    _ = _roll_shift_sign()           # warm the cached roll-direction probe outside jit

    out = jax.block_until_ready(jax.jit(simple_marm_forward)(x, params))
    ref = reference_forward(x, params)

    assert out.shape == (B, C, H, W), out.shape
    assert bool(jnp.all(out >= 0.0)), "ReLU output must be non-negative"
    max_err = float(jnp.max(jnp.abs(out - ref)))
    assert bool(jnp.allclose(out, ref, rtol=1e-4, atol=1e-5)), max_err

    print("KERNEL_OK")
</pallas_src>

<mosaic_0001>
module attributes {stable_mosaic.version = 11 : i64} {
  func.func @probe(%arg0: memref<8x128xf32, #tpu.memory_space<vmem>>, %arg1: memref<8x128xf32, #tpu.memory_space<vmem>>) attributes {dimension_semantics = [], scalar_prefetch = 0 : i64, scratch_operands = 0 : i64, tpu.core_type = #tpu.core_type<tc>} {
    %c0 = arith.constant 0 : index
    %c0_0 = arith.constant 0 : index
    %0 = vector.load %arg0[%c0, %c0_0] : memref<8x128xf32, #tpu.memory_space<vmem>>, vector<8x128xf32>
    %c1_i32 = arith.constant 1 : i32
    %1 = tpu.dynamic_rotate %0 by %c1_i32 dim 1 : vector<8x128xf32>, i32 -> vector<8x128xf32>
    %c0_1 = arith.constant 0 : index
    %c0_2 = arith.constant 0 : index
    %2 = vector.load %arg1[%c0_1, %c0_2] : memref<8x128xf32, #tpu.memory_space<vmem>>, vector<8x128xf32>
    tpu.vector_store %arg1[%c0_1, %c0_2], %1 {strides = array<i32>} : memref<8x128xf32, #tpu.memory_space<vmem>>, vector<8x128xf32>,
    return
  }
}

</mosaic_0001>

<bundles_post_ra>
// kernel: tpu_custom_call.1
= control target key start
LH: loop header
LB: loop body
LE: loop exit
PB: predicated region body
PF: predicated region fallthrough
CT: control target
= control target key end

     0   :  { %6 = vsyncpa [#allocation3], 0  ;;  %s118_s0 = inlined_call_operand.hbm [shape: f32[8,128], index: 0, kind: input, shape index: {}]   ;;  %s119_s1 = inlined_call_operand.hbm [shape: f32[8,128], index: 1, kind: output, shape index: {}]  }
   0x1   :  { %7 = vsyncpa [#allocation4], 0  ;;  %s13_s8 = sshll.u32 %s118_s0, 4  ;;  %s99_s9 = smov [#allocation2]   ;;  %s14_s8 = int_to_ptr.hbm [resolvable:$true] %s13_s8 }
   0x2   :  { %s15_s10 = sshll.u32 %s99_s9, 4  ;;  %s16_s10 = int_to_ptr.vmem [resolvable:$true] %s15_s10 }
   0x3   :  { %18 = dma.hbm_to_vmem [thread:$0]  %s14_s8, 128, %s16_s10, [#allocation3]  }
   0x4   :  { %95 = dma.done.wait [#allocation3], 128  }
   0x5   :  { %96 = vsyncadd [#allocation3], 4294967168  ;;  %v23_v0 = vld [vmem:[#allocation2] sm:$0xff]  ;;  %s100_s11 = smov 1   ;;  %s101_s12 = smov [#allocation5]  }
   0x6   :  { %24 = vrot.lane.b32.xlu0 %v23_v0, %s100_s11  ;;  %s32_s13 = sshll.u32 %s101_s12, 4  ;;  %s34_s16 = sshll.u32 %s119_s1, 4  ;;  %s33_s13 = int_to_ptr.vmem [resolvable:$true] %s32_s13  ;;  %s35_s16 = int_to_ptr.hbm [resolvable:$true] %s34_s16 }
  0x78   :  { %v25_v1 = vpop.permute.xlu0 %24 }
  0x79   :  { %26 = vst [vmem:[#allocation5] sm:$0xff] %v25_v1 }
  0x7a   :  { %37 = dma.vmem_to_hbm [thread:$0]  %s33_s13, 128, %s35_s16, [#allocation4]  }
  0x7b   :  { %97 = dma.done.wait [#allocation4], 128  }
  0x7c   :  { %98 = vsyncadd [#allocation4], 4294967168 }
  0x7d   :  { %42 = vsyncpa [#allocation3], 1 }
  0x7e   :  { %43 = vsyncpa [#allocation4], 1 }

</bundles_post_ra>
